<compile_context>
chip_gen: v5e
topology: v5e:2x2
jax: 0.10.0
libtpu: 0.0.40
codegen_flags: <defaults>
</compile_context>

<pallas_src>
import numpy as np
import jax
import jax.numpy as jnp
from jax.experimental import pallas as pl
from jax.experimental.pallas import tpu as pltpu

# ----- small, TPU-friendly sizes consistent with the module's hyper-parameters -----
VOCAB_SIZE = 128        # len(self.vocab)
EMBED = 16              # embed_size
H_ENC = 32              # hidden_size_encoder
H_DEC = 32              # hidden_size_decoder
CNN = 8                 # cnn_feature_size


# =======================================================================
# decoder init-state transforms: plain XLA (review: a pallas_call here is
# pure launch overhead; let it fuse with the surrounding ops)
#   nn.Linear semantics: y = x @ W^T + b
# =======================================================================
def dec_init_transform(lstm_h, p3d_h, lstm_c, p3d_c, w_h, b_h, w_c, b_c):
    h = jnp.concatenate([lstm_h, p3d_h], axis=1) @ w_h.T + b_h
    c = jnp.concatenate([lstm_c, p3d_c], axis=1) @ w_c.T + b_c
    return h, c


# =======================================================================
# Pallas kernel: vocab projection + online log_softmax + fused gather + mask + exp
#   grid = (row_tiles,)  -- rows (T*B) live on the lane axis, "parallel"
#   Refs (per grid step):
#     xT  : (H+1, TM) bf16   decoder outputs (transposed) + constant-1 bias row
#     w   : (Vp, H+1) bf16   full vocab projection, VMEM-resident (bias fused as
#                            last column; padded vocab rows carry -1e30 there)
#     tgt : (1, TM)  i32     target token ids
#     msk : (1, TM)  f32     pad mask
#   The vocab axis is walked in-kernel in chunks of `v_chunk` rows with an online
#   (flash-style) log-sum-exp; the target logit is gathered on the fly.
#   Outputs (lane-dense (1, TM)): target log-prob * mask, and its exp.
# =======================================================================
def vocab_score(outputsT, w_vocab, b_vocab, targets, target_mask, t_len, b_sz,
                *, tm=256, v_chunk=512):
    hdim = w_vocab.shape[1]
    hdim_aug = hdim + 1
    v_sz = w_vocab.shape[0]
    rows = t_len * b_sz

    # ---- row tiling: lane axis, multiple of 128; aim for >=2 tiles (dual-TC v7x)
    tm = min(tm, pl.cdiv(rows, 128) * 128)
    if rows <= tm and rows > 128:
        tm = max(128, pl.cdiv(rows, 2 * 128) * 128)
    r_pad = pl.cdiv(rows, tm) * tm
    n_rt = r_pad // tm

    # ---- vocab chunking: bounds the live (v_chunk, tm) f32 working set (<=512 KiB)
    v_chunk = min(v_chunk, pl.cdiv(v_sz, 128) * 128)
    v_pad = pl.cdiv(v_sz, v_chunk) * v_chunk
    n_vc = v_pad // v_chunk
    unroll = n_vc <= 8

    # ---- wrapper-side layout plumbing (fuses with the producer under jit) ----
    xT = jnp.concatenate(
        [outputsT.astype(jnp.bfloat16),
         jnp.ones((1, rows), jnp.bfloat16)], axis=0)                    # (H+1, rows)
    xT = jnp.pad(xT, ((0, 0), (0, r_pad - rows)))                       # (H+1, R_pad)

    # bias fused as the last matmul column; padded vocab rows get -1e30 there so
    # they never win the max and their exp underflows to 0 (f32 LSE path).
    b_full = jnp.concatenate(
        [b_vocab.astype(jnp.float32),
         jnp.full((v_pad - v_sz,), -1e30, jnp.float32)])                # (V_pad,)
    w_full = jnp.pad(w_vocab.astype(jnp.float32), ((0, v_pad - v_sz), (0, 0)))
    w_aug = jnp.concatenate([w_full, b_full[:, None]],
                            axis=1).astype(jnp.bfloat16)                # (V_pad, H+1)

    tgt = jnp.pad(targets.astype(jnp.int32).reshape(1, rows),
                  ((0, 0), (0, r_pad - rows)))
    msk = jnp.pad(target_mask.astype(jnp.float32).reshape(1, rows),
                  ((0, 0), (0, r_pad - rows)))

    def kernel(xT_ref, w_ref, tgt_ref, mask_ref, tlp_ref, prob_ref):
        xT_t = xT_ref[...]                         # (H+1, TM) bf16
        tgt_t = tgt_ref[...]                       # (1, TM) i32
        # chunk-local iota, loop-invariant (compare against tgt - offset instead
        # of adding the offset to a (v_chunk, TM) tensor each step)
        v_iota = jax.lax.broadcasted_iota(jnp.int32, (v_chunk, tm), 0)

        def body(c, carry):
            m_prev, l_prev, t_prev = carry
            off = c * v_chunk
            w_c = w_ref[pl.ds(pl.multiple_of(off, v_chunk), v_chunk), :]
            # (VC, H+1) @ (H+1, TM) -> (VC, TM); bias comes from the ones-row
            logits = jnp.dot(w_c, xT_t, preferred_element_type=jnp.float32)
            # fused gather of the target logit
            sel = v_iota == (tgt_t - off)
            t_new = t_prev + jnp.sum(jnp.where(sel, logits, 0.0),
                                     axis=0, keepdims=True)
            # online log-sum-exp (f32)
            m_new = jnp.maximum(m_prev, jnp.max(logits, axis=0, keepdims=True))
            l_new = (l_prev * jnp.exp(m_prev - m_new)
                     + jnp.sum(jnp.exp(logits - m_new), axis=0, keepdims=True))
            return m_new, l_new, t_new

        init = (jnp.full((1, tm), -jnp.inf, jnp.float32),
                jnp.zeros((1, tm), jnp.float32),
                jnp.zeros((1, tm), jnp.float32))
        m, l, t = jax.lax.fori_loop(0, n_vc, body, init, unroll=unroll)

        lse = m + jnp.log(l)
        tlp = (t - lse) * mask_ref[...]            # gather * mask (as in reference)
        tlp_ref[...] = tlp
        prob_ref[...] = jnp.exp(tlp)

    tlp_p, prob_p = pl.pallas_call(
        kernel,
        out_shape=(jax.ShapeDtypeStruct((1, r_pad), jnp.float32),
                   jax.ShapeDtypeStruct((1, r_pad), jnp.float32)),
        grid_spec=pltpu.PrefetchScalarGridSpec(
            num_scalar_prefetch=0,
            grid=(n_rt,),
            in_specs=[
                pl.BlockSpec((hdim_aug, tm), lambda i: (0, i)),     # xT row tile
                pl.BlockSpec((v_pad, hdim_aug), lambda i: (0, 0)),  # w: VMEM-resident
                pl.BlockSpec((1, tm), lambda i: (0, i)),            # tgt
                pl.BlockSpec((1, tm), lambda i: (0, i)),            # mask
            ],
            out_specs=(
                pl.BlockSpec((1, tm), lambda i: (0, i)),            # tlp (lane-dense)
                pl.BlockSpec((1, tm), lambda i: (0, i)),            # prob (lane-dense)
            ),
        ),
        compiler_params=pltpu.CompilerParams(
            dimension_semantics=("parallel",)),
    )(xT, w_aug, tgt, msk)

    tlp = tlp_p[0, :rows].reshape(t_len, b_sz)
    prob = prob_p[0, :rows].reshape(t_len, b_sz)
    scores = jnp.sum(tlp, axis=0)                                       # (B,)
    return tlp, prob, scores


# =======================================================================
# Host-side glue (padding / vocab / masks) — mirrors the PyTorch methods
# =======================================================================
def pad_vid_frames(source):
    source = sorted(source, key=len, reverse=True)
    lengths = [len(v) for v in source]
    max_len = lengths[0]
    feat = len(source[0][0])
    padded = [v + [[0.0] * feat] * (max_len - len(v)) for v in source]
    arr = jnp.asarray(padded, dtype=jnp.float32).transpose(1, 0, 2)   # (T, B, feat)
    return lengths, arr


def pad_captions(captions, vocab):
    captions = sorted(captions, key=len, reverse=True)
    lengths = [len(s) + 2 for s in captions]
    max_len = lengths[0] - 2
    padded = []
    for s in captions:
        padded.append([vocab['<start>']]
                      + [vocab.get(w, vocab['<unk>']) for w in s]
                      + [vocab['<end>']]
                      + [vocab['<pad>']] * (max_len - len(s)))
    arr = jnp.asarray(padded, dtype=jnp.int32).T                      # (T_cap, B)
    return lengths, arr


def generate_masks(b_sz, t_len, source_lengths):
    masks = np.zeros((b_sz, t_len), dtype=np.float32)
    for e_id, src_len in enumerate(source_lengths):
        masks[e_id, src_len:] = 1.0
    return jnp.asarray(masks)


# ----- deterministic stand-ins for the undefined encoder/decoder classes -----
def lstm_encoder_stub(vids_padded, p):
    # TODO(synk): real LSTMEncoder not given; linear+tanh stand-in.
    enc = jnp.tanh(jnp.einsum('tbf,fh->tbh', vids_padded, p['w_lstm_enc']))
    enc_hiddens = enc.transpose(1, 0, 2)                              # (B, T, H_enc)
    mean = enc.mean(axis=0)                                           # (B, H_enc)
    h = jnp.tanh(mean @ p['w_lstm_ih'])
    c = jnp.tanh(mean @ p['w_lstm_ic'])
    return enc_hiddens, (h, c), (h, c)


def p3d_encoder_stub(feats_padded, p):
    # TODO(synk): real P3DEncoder not given; linear+tanh stand-in.
    enc = jnp.tanh(jnp.einsum('tbf,fh->tbh', feats_padded, p['w_p3d_enc']))
    enc_hiddens = enc.transpose(1, 0, 2)
    mean = enc.mean(axis=0)
    h = jnp.tanh(mean @ p['w_p3d_ih'])
    c = jnp.tanh(mean @ p['w_p3d_ic'])
    return enc_hiddens, (h, c), (h, c)


def decoder_stub(enc_hiddens, enc_masks, p3d_hiddens, p3d_masks,
                 dec_init_state_1, emb, p):
    # TODO(synk): real EnsembleDecoder not given; deterministic attention-free stand-in.
    ctx = enc_hiddens.mean(axis=1) @ p['w_ctx']                       # (B, H_dec)
    pctx = p3d_hiddens.mean(axis=1) @ p['w_pctx']
    h0 = dec_init_state_1[0]
    outputs = jnp.tanh(jnp.einsum('tbe,eh->tbh', emb, p['w_ey'])
                       + (h0 + ctx + pctx)[None, :, :])               # (T-1, B, H)
    t_len, b_sz, hdim = outputs.shape
    # emit the lane-major (H, T*B) bf16 slab the vocab kernel wants directly, so
    # (under jit) the transpose/cast fuses with the producer — no extra HBM trip.
    outputsT = outputs.reshape(t_len * b_sz, hdim).T.astype(jnp.bfloat16)
    return outputsT, t_len, b_sz


@jax.jit
def _forward_core(vids_padded, feats_padded, captions_padded,
                  enc_masks, p3d_masks, target_masks, params):
    captions_ex_last = captions_padded[:-1]
    emb = params['emb'][captions_ex_last]                             # (T_cap-1, B, E)

    enc_hiddens, lstm_init1, _ = lstm_encoder_stub(vids_padded, params)
    p3d_hiddens, p3d_init1, _ = p3d_encoder_stub(feats_padded, params)

    # decoder init-state transforms: plain XLA (fuses; no kernel launch overhead)
    dec_h, dec_c = dec_init_transform(
        lstm_init1[0], p3d_init1[0], lstm_init1[1], p3d_init1[1],
        params['w_init_h'], params['b_init_h'],
        params['w_init_c'], params['b_init_c'])

    outputsT, t_len, b_sz = decoder_stub(enc_hiddens, enc_masks,
                                         p3d_hiddens, p3d_masks,
                                         (dec_h, dec_c), emb, params)

    # Pallas kernel: vocab projection + online log_softmax + fused gather + mask + exp
    tlp, prob, scores = vocab_score(outputsT, params['w_vocab'], params['b_vocab'],
                                    captions_padded[1:], target_masks[1:],
                                    t_len, b_sz)
    return scores, prob, tlp


def ensemble_forward(source, captions, vocab, params):
    vids_len, vids_padded = pad_vid_frames(source[0])
    feats_len, feats_padded = pad_vid_frames(source[1])
    _, captions_padded = pad_captions(captions, vocab)                # (T_cap, B) i32

    enc_masks = generate_masks(vids_padded.shape[1], vids_padded.shape[0], vids_len)
    p3d_masks = generate_masks(feats_padded.shape[1], feats_padded.shape[0], feats_len)
    target_masks = (captions_padded != vocab['<pad>']).astype(jnp.float32)

    return _forward_core(vids_padded, feats_padded, captions_padded,
                         enc_masks, p3d_masks, target_masks, params)


def init_params(key):
    ks = jax.random.split(key, 16)

    def nrm(k, shape):
        return jax.random.normal(k, shape, dtype=jnp.float32) * 0.02

    emb = nrm(ks[0], (VOCAB_SIZE, EMBED)).at[0].set(0.0)              # padding_idx = 0
    return dict(
        emb=emb,
        w_lstm_enc=nrm(ks[1], (CNN, H_ENC)),
        w_p3d_enc=nrm(ks[2], (CNN, H_ENC)),
        w_lstm_ih=nrm(ks[3], (H_ENC, H_DEC)),
        w_lstm_ic=nrm(ks[4], (H_ENC, H_DEC)),
        w_p3d_ih=nrm(ks[5], (H_ENC, H_DEC)),
        w_p3d_ic=nrm(ks[6], (H_ENC, H_DEC)),
        w_init_h=nrm(ks[7], (H_DEC, 2 * H_DEC)),
        b_init_h=nrm(ks[8], (H_DEC,)),
        w_init_c=nrm(ks[9], (H_DEC, 2 * H_DEC)),
        b_init_c=nrm(ks[10], (H_DEC,)),
        w_ctx=nrm(ks[11], (H_ENC, H_DEC)),
        w_pctx=nrm(ks[12], (H_ENC, H_DEC)),
        w_ey=nrm(ks[13], (EMBED, H_DEC)),
        w_vocab=nrm(ks[14], (VOCAB_SIZE, H_DEC)),
        b_vocab=nrm(ks[15], (VOCAB_SIZE,)),
    )


if __name__ == "__main__":
    key = jax.random.PRNGKey(0)
    pkey, dkey = jax.random.split(key)
    params = init_params(pkey)

    # synthetic vocab (no file I/O)
    vocab = {'<pad>': 0, '<start>': 1, '<end>': 2, '<unk>': 3}
    for i in range(4, VOCAB_SIZE):
        vocab['w%d' % i] = i

    # synthetic variable-length videos / 3D features (lists, like the PyTorch API)
    d0, d1, d2, d3 = jax.random.split(dkey, 4)
    source_lstm = [
        (jax.random.normal(d0, (5, CNN)) * 0.5).tolist(),
        (jax.random.normal(d1, (3, CNN)) * 0.5).tolist(),
    ]
    source_p3d = [
        (jax.random.normal(d2, (4, CNN)) * 0.5).tolist(),
        (jax.random.normal(d3, (6, CNN)) * 0.5).tolist(),
    ]
    captions = [
        ['w4', 'w5', 'w6', 'w7', 'w8', 'w9'],
        ['w10', 'w11', 'w12', 'w13'],
    ]

    scores, prob, target_words_log_prob = ensemble_forward(
        (source_lstm, source_p3d), captions, vocab, params)
    jax.block_until_ready((scores, prob, target_words_log_prob))

    assert scores.shape == (2,)
    assert prob.shape == target_words_log_prob.shape == (7, 2)
    assert bool(jnp.all(jnp.isfinite(scores)))
    assert bool(jnp.all(jnp.isfinite(prob)))
    print("KERNEL_OK")
</pallas_src>

<mosaic_0001>
module attributes {stable_mosaic.version = 11 : i64} {
  func.func @kernel(%arg0: i32, %arg1: memref<33x128xbf16, #tpu.memory_space<vmem>>, %arg2: memref<128x33xbf16, #tpu.memory_space<vmem>>, %arg3: memref<1x128xi32, #tpu.memory_space<vmem>>, %arg4: memref<1x128xf32, #tpu.memory_space<vmem>>, %arg5: memref<1x128xf32, #tpu.memory_space<vmem>>, %arg6: memref<1x128xf32, #tpu.memory_space<vmem>>) attributes {dimension_semantics = [#tpu.dimension_semantics<parallel>], iteration_bounds = array<i64: 1>, scalar_prefetch = 0 : i64, scratch_operands = 0 : i64, tpu.core_type = #tpu.core_type<tc>, window_params = [{transform_indices = @transform_0, window_bounds = array<i64: 33, 128>}, {pipeline_mode = #tpu.pipeline_mode<synchronous>, transform_indices = @transform_1, window_bounds = array<i64: 128, 33>}, {transform_indices = @transform_2, window_bounds = array<i64: 1, 128>}, {transform_indices = @transform_3, window_bounds = array<i64: 1, 128>}, {transform_indices = @transform_4, window_bounds = array<i64: 1, 128>}, {transform_indices = @transform_5, window_bounds = array<i64: 1, 128>}]} {
    %c0 = arith.constant 0 : index
    %c0_0 = arith.constant 0 : index
    %0 = vector.load %arg1[%c0, %c0_0] : memref<33x128xbf16, #tpu.memory_space<vmem>>, vector<33x128xbf16>
    %c0_1 = arith.constant 0 : index
    %c0_2 = arith.constant 0 : index
    %1 = vector.load %arg3[%c0_1, %c0_2] : memref<1x128xi32, #tpu.memory_space<vmem>>, vector<1x128xi32>
    %2 = tpu.iota {dimensions = array<i32: 0>} : vector<128x128xi32>
    %cst = arith.constant 0xFF800000 : f32
    %3 = vector.broadcast %cst : f32 to vector<1x128xf32>
    %cst_3 = arith.constant 0.000000e+00 : f32
    %4 = vector.broadcast %cst_3 : f32 to vector<1x128xf32>
    %cst_4 = arith.constant 0.000000e+00 : f32
    %5 = vector.broadcast %cst_4 : f32 to vector<1x128xf32>
    %c0_i32 = arith.constant 0 : i32
    %c128_i32 = arith.constant 128 : i32
    %6 = arith.muli %c0_i32, %c128_i32 : i32
    %7 = tpu.assume_multiple %6, 128 : i32
    %8 = arith.index_cast %7 : i32 to index
    %c0_5 = arith.constant 0 : index
    %9 = vector.load %arg2[%8, %c0_5] : memref<128x33xbf16, #tpu.memory_space<vmem>>, vector<128x33xbf16>
    %cst_6 = arith.constant dense<0.000000e+00> : vector<128x128xf32>
    %10 = tpu.matmul %9, %0, %cst_6 {dimension_numbers = #tpu.dot_dimension_numbers<[1], [0], [0], [1], [0, 0, 1, 1], [], []>} : vector<128x33xbf16>, vector<33x128xbf16>, vector<128x128xf32> -> vector<128x128xf32>
    %11 = vector.broadcast %6 : i32 to vector<1x128xi32>
    %12 = arith.subi %1, %11 : vector<1x128xi32>
    %13 = vector.broadcast %12 : vector<1x128xi32> to vector<128x128xi32>
    %14 = arith.cmpi eq, %2, %13 : vector<128x128xi32>
    %cst_7 = arith.constant 0.000000e+00 : f32
    %15 = vector.broadcast %cst_7 : f32 to vector<128x128xf32>
    %16 = arith.select %14, %10, %15 : vector<128x128xi1>, vector<128x128xf32>
    %cst_8 = arith.constant dense<0.000000e+00> : vector<128xf32>
    %17 = vector.multi_reduction <add>, %16, %cst_8 [0] : vector<128x128xf32> to vector<128xf32>
    %18 = vector.shape_cast %17 : vector<128xf32> to vector<1x128xf32>
    %19 = arith.addf %5, %18 : vector<1x128xf32>
    %cst_9 = arith.constant dense<0xFF800000> : vector<128xf32>
    %20 = vector.multi_reduction <maximumf>, %10, %cst_9 [0] : vector<128x128xf32> to vector<128xf32>
    %21 = vector.shape_cast %20 : vector<128xf32> to vector<1x128xf32>
    %22 = arith.maximumf %3, %21 : vector<1x128xf32>
    %23 = arith.subf %3, %22 : vector<1x128xf32>
    %24 = math.exp %23 : vector<1x128xf32>
    %25 = arith.mulf %4, %24 : vector<1x128xf32>
    %26 = vector.broadcast %22 : vector<1x128xf32> to vector<128x128xf32>
    %27 = arith.subf %10, %26 : vector<128x128xf32>
    %28 = math.exp %27 : vector<128x128xf32>
    %cst_10 = arith.constant dense<0.000000e+00> : vector<128xf32>
    %29 = vector.multi_reduction <add>, %28, %cst_10 [0] : vector<128x128xf32> to vector<128xf32>
    %30 = vector.shape_cast %29 : vector<128xf32> to vector<1x128xf32>
    %31 = arith.addf %25, %30 : vector<1x128xf32>
    %c1_i32 = arith.constant 1 : i32
    %32 = math.log %31 : vector<1x128xf32>
    %33 = arith.addf %22, %32 : vector<1x128xf32>
    %34 = arith.subf %19, %33 : vector<1x128xf32>
    %c0_11 = arith.constant 0 : index
    %c0_12 = arith.constant 0 : index
    %35 = vector.load %arg4[%c0_11, %c0_12] : memref<1x128xf32, #tpu.memory_space<vmem>>, vector<1x128xf32>
    %36 = arith.mulf %34, %35 : vector<1x128xf32>
    %c0_13 = arith.constant 0 : index
    %c0_14 = arith.constant 0 : index
    %37 = vector.load %arg5[%c0_13, %c0_14] : memref<1x128xf32, #tpu.memory_space<vmem>>, vector<1x128xf32>
    tpu.vector_store %arg5[%c0_13, %c0_14], %36 {strides = array<i32>} : memref<1x128xf32, #tpu.memory_space<vmem>>, vector<1x128xf32>,
    %38 = math.exp %36 : vector<1x128xf32>
    %c0_15 = arith.constant 0 : index
    %c0_16 = arith.constant 0 : index
    %39 = vector.load %arg6[%c0_15, %c0_16] : memref<1x128xf32, #tpu.memory_space<vmem>>, vector<1x128xf32>
    tpu.vector_store %arg6[%c0_15, %c0_16], %38 {strides = array<i32>} : memref<1x128xf32, #tpu.memory_space<vmem>>, vector<1x128xf32>,
    return
  }
  func.func @transform_0(%arg0: i32) -> (i32, i32) {
    %c0_i32 = arith.constant 0 : i32
    %c0_i32_0 = arith.constant 0 : i32
    return %c0_i32, %arg0 : i32, i32
  }
  func.func @transform_1(%arg0: i32) -> (i32, i32) {
    %c0_i32 = arith.constant 0 : i32
    %c0_i32_0 = arith.constant 0 : i32
    %c0_i32_1 = arith.constant 0 : i32
    return %c0_i32, %c0_i32_0 : i32, i32
  }
  func.func @transform_2(%arg0: i32) -> (i32, i32) {
    %c0_i32 = arith.constant 0 : i32
    %c0_i32_0 = arith.constant 0 : i32
    return %c0_i32, %arg0 : i32, i32
  }
  func.func @transform_3(%arg0: i32) -> (i32, i32) {
    %c0_i32 = arith.constant 0 : i32
    %c0_i32_0 = arith.constant 0 : i32
    return %c0_i32, %arg0 : i32, i32
  }
  func.func @transform_4(%arg0: i32) -> (i32, i32) {
    %c0_i32 = arith.constant 0 : i32
    %c0_i32_0 = arith.constant 0 : i32
    return %c0_i32, %arg0 : i32, i32
  }
  func.func @transform_5(%arg0: i32) -> (i32, i32) {
    %c0_i32 = arith.constant 0 : i32
    %c0_i32_0 = arith.constant 0 : i32
    return %c0_i32, %arg0 : i32, i32
  }
}

</mosaic_0001>

<bundles_post_ra>
// kernel: squeeze.2
= control target key start
LH: loop header
LB: loop body
LE: loop exit
PB: predicated region body
PF: predicated region fallthrough
CT: control target
= control target key end

     0   :  { %s58_s8 = smov 126   ;;  %s59_s9 = smov 118   ;;  %vm7_vm0 = vcmask 15360   ;;  %s97_s0 = inlined_call_operand.vmem [shape: f32[14], index: 0, kind: input, shape index: {}]   ;;  %s98_s1 = inlined_call_operand.vmem [shape: f32[7,2], index: 1, kind: output, shape index: {}]  }
   0x1   :  { %v4_v0 = vld [vmem:[%s97_s0] sm:$0x1]  ;;  %s57_s0 = smov 122   ;;  %s60_s10 = smov 120  }
   0x2   :  { %5 = vst [vmem:[#allocation0] sm:$0x1] %v4_v0  ;;  %s61_s11 = smov 124   ;;  %s62_s12 = smov 116  }
   0x9   :  { %v21_v1 = vld [vmem:[#allocation0] sm:$0x1]  }
   0xa   :  { %v9_v2 = vld [vmem:[#allocation0] sm:$0x1]   ;;  %22 = vrot.lane.b32.xlu1 %v21_v1, %s57_s0 }
   0xb   :  { %10 = vrot.lane.b32.xlu0 %v9_v2, %s58_s8  ;;  %v33_v3 = vld [vmem:[#allocation0] sm:$0x1]  }
   0xc   :  { %34 = vrot.lane.b32.xlu2 %v33_v3, %s59_s9  ;;  %v27_v4 = vld [vmem:[#allocation0] sm:$0x1]  }
   0xd   :  { %v15_v5 = vld [vmem:[#allocation0] sm:$0x1]  }
   0xe   :  { %v39_v6 = vld [vmem:[#allocation0] sm:$0x1]  }
   0xf   :  { %v6_v7 = vld [vmem:[#allocation0] sm:$0x1]  }
  0x10   :  { %8 = vst.msk [vmem:[%s98_s1] sm:$0x1] %vm7_vm0, %v6_v7  }
  0x12   :  { %28 = vrot.lane.b32.xlu1 %v27_v4, %s60_s10 }
  0x13   :  { %16 = vrot.lane.b32.xlu0 %v15_v5, %s61_s11 }
  0x14   :  { %40 = vrot.lane.b32.xlu2 %v39_v6, %s62_s12 }
  0x66   :  { %v35_v8 = vpop.permute.xlu2 %34  }
  0x67   :  { %49 = vst.msk [vmem:[%s98_s1 + $0x5] sm:$0x1] %vm7_vm0, %v35_v8  }
  0x6e   :  { %v41_v9 = vpop.permute.xlu2 %40  }
  0x6f   :  { %50 = vst.msk [vmem:[%s98_s1 + $0x6] sm:$0x1] %vm7_vm0, %v41_v9  }
  0x7c   :  { %v23_v10 = vpop.permute.xlu1 %22  }
  0x7d   :  { %v11_v11 = vpop.permute.xlu0 %10   ;;  %47 = vst.msk [vmem:[%s98_s1 + $0x3] sm:$0x1] %vm7_vm0, %v23_v10  }
  0x7e   :  { %45 = vst.msk [vmem:[%s98_s1 + $0x1] sm:$0x1] %vm7_vm0, %v11_v11  }
  0x84   :  { %v29_v12 = vpop.permute.xlu1 %28  }
  0x85   :  { %v17_v13 = vpop.permute.xlu0 %16   ;;  %48 = vst.msk [vmem:[%s98_s1 + $0x4] sm:$0x1] %vm7_vm0, %v29_v12  }
  0x86   :  { %46 = vst.msk [vmem:[%s98_s1 + $0x2] sm:$0x1] %vm7_vm0, %v17_v13  }

// kernel: _forward_core.1
= control target key start
LH: loop header
LB: loop body
LE: loop exit
PB: predicated region body
PF: predicated region fallthrough
CT: control target
= control target key end

     0   :  { %vm139_vm0 = vcmask 1040384   ;;  %v469_v2 = vmov 0   ;;  %vm114_vm1 = vcmask 269312   ;;  %v26_v18 = vlaneseq  ;;  %s693_s0 = inlined_call_operand.vmem [shape: bf16[33,128], index: 0, kind: input, shape index: {}]   ;;  %s694_s2 = inlined_call_operand.vmem [shape: s32[1,128], index: 2, kind: input, shape index: {}]   ;;  %s695_s1 = inlined_call_operand.vmem [shape: bf16[128,33], index: 1, kind: input, shape index: {}]   ;;  %s696_s3 = inlined_call_operand.vmem [shape: f32[1,128], index: 3, kind: input, shape index: {}]   ;;  %s697_s4 = inlined_call_operand.vmem [shape: f32[1,128], index: 4, kind: output, shape index: {0}]   ;;  %s698_s5 = inlined_call_operand.vmem [shape: f32[1,128], index: 5, kind: output, shape index: {1}]  }
   0x1   :  { %v24_v0 = vld [vmem:[%s693_s0 + $0x10] sm:$0x1]  ;;  %v141_v3 = vsel %vm139_vm0, 65535, %v469_v2  ;;  %v411_v6 = vld [vmem:[%s693_s0 + $0x8] sm:$0xff]  ;;  %v410_v7 = vld [vmem:[%s693_s0] sm:$0xff] }
   0x2   :  { %v108_v1 = vunpack.c.l.b16 %v24_v0  ;;  %v412_v8 = vld [vmem:[%s695_s1] sm:$0xff]  ;;  %v414_v9 = vld [vmem:[%s695_s1 + $0x10] sm:$0xff]  ;;  %v413_v12 = vld [vmem:[%s695_s1 + $0x8] sm:$0xff]  ;;  %v553_v23 = vshrl.u32 %v26_v18, 7 }
   0x3   :  { %v416_v10 = vld [vmem:[%s695_s1 + $0x20] sm:$0xff]  ;;  %v418_v11 = vld [vmem:[%s695_s1 + $0x30] sm:$0xff]  ;;  %v415_v13 = vld [vmem:[%s695_s1 + $0x18] sm:$0xff] }
   0x4   :  { %v111_v4 = vpack.c.b16 %v108_v1, %v108_v1  ;;  %v417_v14 = vld [vmem:[%s695_s1 + $0x28] sm:$0xff]  ;;  %v419_v15 = vld [vmem:[%s695_s1 + $0x38] sm:$0xff]  ;;  %v28_v24 = vadd.s32 8, %v553_v23  ;;  %v559_v25 = vld [vmem:[%s694_s2] ss:$0 sm:$0xff]  ;;  %v29_v26 = vadd.s32 16, %v553_v23 }
   0x5   :  { %vm195_vm3 = vcmp.eq.s32.totalorder %v553_v23, %v559_v25  ;;  %v30_v31 = vadd.s32 24, %v553_v23  ;;  %v31_v33 = vadd.s32 32, %v553_v23  ;;  %v32_v35 = vadd.s32 40, %v553_v23 }
   0x6   :  { %v143_v5 = vand.u32 %v141_v3, %v111_v4  ;;  %vm196_vm2 = vcmp.eq.s32.totalorder %v28_v24, %v559_v25  ;;  %vm197_vm4 = vcmp.eq.s32.totalorder %v29_v26, %v559_v25  ;;  %v33_v41 = vadd.s32 48, %v553_v23 }
   0x7   :  { %vm198_vm5 = vcmp.eq.s32.totalorder %v30_v31, %v559_v25  ;;  %vm199_vm6 = vcmp.eq.s32.totalorder %v31_v33, %v559_v25  ;;  %vm200_vm7 = vcmp.eq.s32.totalorder %v32_v35, %v559_v25  ;;  %v34_v44 = vadd.s32 56, %v553_v23 }
   0x8   :  { %150 = vmatpush.bf16.msra.mxu0 %v143_v5  ;;  %420 = vmatpush.bf16.msra.mxu1 %v143_v5  ;;  %v35_v50 = vadd.s32 64, %v553_v23  ;;  %vm201_vm8 = vcmp.eq.s32.totalorder %v33_v41, %v559_v25  ;;  %v36_v55 = vadd.s32 72, %v553_v23  ;;  %v37_v63 = vadd.s32 80, %v553_v23 }
   0x9   :  { %421 = vmatpush.bf16.msra.mxu2 %v143_v5  ;;  %422 = vmatpush.bf16.msra.mxu3 %v143_v5  ;;  %vm202_vm9 = vcmp.eq.s32.totalorder %v34_v44, %v559_v25  ;;  %v38_v3 = vadd.s32 88, %v553_v23  ;;  %v41_v31 = vadd.s32 112, %v553_v23 }
   0xa   :  { %vm203_vm10 = vcmp.eq.s32.totalorder %v35_v50, %v559_v25  ;;  %vm204_vm11 = vcmp.eq.s32.totalorder %v36_v55, %v559_v25  ;;  %vm205_vm12 = vcmp.eq.s32.totalorder %v37_v63, %v559_v25 }
   0xb   :  { %vm206_vm13 = vcmp.eq.s32.totalorder %v38_v3, %v559_v25  ;;  %vm209_vm0 = vcmp.eq.s32.totalorder %v41_v31, %v559_v25 }
   0xc   :  { %151 = vmatpush.bf16.msra.mxu0 %v411_v6  ;;  %423 = vmatpush.bf16.msra.mxu1 %v411_v6 }
   0xd   :  { %424 = vmatpush.bf16.msra.mxu2 %v411_v6  ;;  %425 = vmatpush.bf16.msra.mxu3 %v411_v6 }
  0x10   :  { %152 = vmatpush.bf16.msra.mxu0 %v410_v7  ;;  %426 = vmatpush.bf16.msra.mxu1 %v410_v7 }
  0x11   :  { %427 = vmatpush.bf16.msra.mxu2 %v410_v7  ;;  %428 = vmatpush.bf16.msra.mxu3 %v410_v7 }
  0x13   :  { %402 = vmatmul.msk.bf16.vlgmr.msra.gmra.mxu0 %vm114_vm1, %v412_v8  ;;  %404 = vmatmul.msk.bf16.vlgmr.msra.gmra.mxu1 %vm114_vm1, %v414_v9 }
  0x14   :  { %406 = vmatmul.msk.bf16.vlgmr.msra.gmra.mxu2 %vm114_vm1, %v416_v10  ;;  %408 = vmatmul.msk.bf16.vlgmr.msra.gmra.mxu3 %vm114_vm1, %v418_v11  ;;  %v39_v10 = vadd.s32 96, %v553_v23 }
  0x16   :  { %vm207_vm14 = vcmp.eq.s32.totalorder %v39_v10, %v559_v25 }
  0x23   :  { %403 = vmatmul.msk.bf16.gmra.mxu0 %vm114_vm1, %v413_v12  ;;  %405 = vmatmul.msk.bf16.gmra.mxu1 %vm114_vm1, %v415_v13 }
  0x24   :  { %407 = vmatmul.msk.bf16.gmra.mxu2 %vm114_vm1, %v417_v14  ;;  %409 = vmatmul.msk.bf16.gmra.mxu3 %vm114_vm1, %v419_v15  ;;  %v40_v15 = vadd.s32 104, %v553_v23 }
  0x26   :  { %vm208_vm15 = vcmp.eq.s32.totalorder %v40_v15, %v559_v25 }
  0x90   :  { %v541_v16 = vpop.f32.mrf.mxu0  ;;  %v543_v17 = vpop.f32.mrf.mxu1 }
  0x91   :  { %v211_v34 = vsel %vm195_vm3, %v541_v16, 0.0  ;;  %v249_v45 = vmax.f32 %v541_v16, %v543_v17  ;;  %v215_v49 = vsel %vm199_vm6, %v543_v17, 0.0 }
  0x97   :  { %v545_v19 = vpop.f32.mrf.mxu2  ;;  %v547_v20 = vpop.f32.mrf.mxu3 }
  0x98   :  { %v549_v21 = vpop.f32.mrf.mxu0  ;;  %v551_v22 = vpop.f32.mrf.mxu1  ;;  %v253_v56 = vmax.f32 %v249_v45, %v545_v19  ;;  %v219_v9 = vsel %vm203_vm10, %v545_v19, 0.0 }
  0x99   :  { %v212_v32 = vsel %vm196_vm2, %v549_v21, 0.0  ;;  %v250_v46 = vmax.f32 %v549_v21, %v551_v22  ;;  %v216_v54 = vsel %vm200_vm7, %v551_v22, 0.0 }
  0x9a   :  { %v227_v37 = vadd.f32 %v212_v32, %v211_v34  ;;  %v257_v5 = vmax.f32 %v253_v56, %v547_v20 }
  0x9f   :  { %v562_v27 = vpop.f32.mrf.mxu2  ;;  %v564_v28 = vpop.f32.mrf.mxu3 }
  0xa0   :  { %v567_v29 = vpop.f32.mrf.mxu0  ;;  %v569_v30 = vpop.f32.mrf.mxu1  ;;  %v254_v52 = vmax.f32 %v250_v46, %v562_v27  ;;  %v220_v14 = vsel %vm204_vm11, %v562_v27, 0.0  ;;  %v224_v44 = vsel %vm208_vm15, %v564_v28, 0.0 }
  0xa1   :  { %v213_v36 = vsel %vm197_vm4, %v567_v29, 0.0  ;;  %v251_v47 = vmax.f32 %v567_v29, %v569_v30  ;;  %v217_v60 = vsel %vm201_vm8, %v569_v30, 0.0 }
  0xa2   :  { %v228_v40 = vadd.f32 %v227_v37, %v213_v36  ;;  %v258_v62 = vmax.f32 %v254_v52, %v564_v28  ;;  %v42_v36 = vadd.s32 120, %v553_v23 }
  0xa4   :  { %v261_v11 = vmax.f32 %v257_v5, %v258_v62  ;;  %vm210_vm1 = vcmp.eq.s32.totalorder %v42_v36, %v559_v25 }
  0xa7   :  { %v581_v38 = vpop.f32.mrf.mxu2  ;;  %v583_v39 = vpop.f32.mrf.mxu3 }
  0xa8   :  { %v587_v42 = vpop.f32.mrf.mxu0  ;;  %v600_v51 = vpop.f32.mrf.mxu1  ;;  %v255_v57 = vmax.f32 %v251_v47, %v581_v38  ;;  %v221_v26 = vsel %vm205_vm12, %v581_v38, 0.0  ;;  %v225_v47 = vsel %vm209_vm0, %v583_v39, 0.0 }
  0xa9   :  { %v214_v43 = vsel %vm198_vm5, %v587_v42, 0.0  ;;  %v252_v59 = vmax.f32 %v587_v42, %v600_v51  ;;  %v218_v2 = vsel %vm202_vm9, %v600_v51, 0.0 }
  0xaa   :  { %v229_v48 = vadd.f32 %v228_v40, %v214_v43  ;;  %v259_v6 = vmax.f32 %v255_v57, %v583_v39  ;;  %v223_v40 = vsel %vm207_vm14, %v547_v20, 0.0 }
  0xac   :  { %v230_v53 = vadd.f32 %v229_v48, %v215_v49 }
  0xae   :  { %v231_v58 = vadd.f32 %v230_v53, %v216_v54 }
  0xaf   :  { %v613_v61 = vpop.f32.mrf.mxu2  ;;  %v621_v4 = vpop.f32.mrf.mxu3 }
  0xb0   :  { %v232_v0 = vadd.f32 %v231_v58, %v217_v60  ;;  %v256_v1 = vmax.f32 %v252_v59, %v613_v61  ;;  %v222_v34 = vsel %vm206_vm13, %v613_v61, 0.0  ;;  %v226_v50 = vsel %vm210_vm1, %v621_v4, 0.0 }
  0xb2   :  { %v233_v7 = vadd.f32 %v232_v0, %v218_v2  ;;  %v260_v8 = vmax.f32 %v256_v1, %v621_v4 }
  0xb4   :  { %v234_v12 = vadd.f32 %v233_v7, %v219_v9  ;;  %v262_v13 = vmax.f32 %v259_v6, %v260_v8 }
  0xb6   :  { %v235_v18 = vadd.f32 %v234_v12, %v220_v14  ;;  %v263_v24 = vmax.f32 %v261_v11, %v262_v13 }
  0xb8   :  { %v236_v32 = vadd.f32 %v235_v18, %v221_v26  ;;  %v264_v33 = vrot.slane %v263_v24, 4 }
  0xba   :  { %v237_v35 = vadd.f32 %v236_v32, %v222_v34  ;;  %v265_v37 = vmax.f32 %v263_v24, %v264_v33 }
  0xbc   :  { %v238_v41 = vadd.f32 %v237_v35, %v223_v40  ;;  %v266_v43 = vrot.slane %v265_v37, 2 }
  0xbe   :  { %v239_v45 = vadd.f32 %v238_v41, %v224_v44  ;;  %v267_v46 = vmax.f32 %v265_v37, %v266_v43 }
  0xc0   :  { %v240_v48 = vadd.f32 %v239_v45, %v225_v47  ;;  %v268_v49 = vrot.slane %v267_v46, 1 }
  0xc2   :  { %v644_v23 = vadd.f32 %v240_v48, %v226_v50  ;;  %v646_v52 = vmax.f32 %v267_v46, %v268_v49 }
  0xc4   :  { %v274_v53 = vsub.f32 %v541_v16, %v646_v52  ;;  %v275_v54 = vsub.f32 %v549_v21, %v646_v52  ;;  %v276_v25 = vsub.f32 %v567_v29, %v646_v52  ;;  %v277_v55 = vsub.f32 %v587_v42, %v646_v52 }
  0xc5   :  { %v278_v58 = vsub.f32 %v543_v17, %v646_v52  ;;  %v279_v60 = vsub.f32 %v551_v22, %v646_v52  ;;  %v280_v21 = vsub.f32 %v569_v30, %v646_v52  ;;  %v281_v42 = vsub.f32 %v600_v51, %v646_v52 }
  0xc6   :  { %v290_v56 = vmul.f32 1.442695, %v274_v53  ;;  %v292_v57 = vmul.f32 1.442695, %v275_v54  ;;  %v294_v59 = vmul.f32 1.442695, %v276_v25  ;;  %v282_v17 = vsub.f32 %v545_v19, %v646_v52 }
  0xc7   :  { %v296_v16 = vmul.f32 1.442695, %v277_v55  ;;  %v298_v29 = vmul.f32 1.442695, %v278_v58  ;;  %v300_v62 = vmul.f32 1.442695, %v279_v60  ;;  %v283_v3 = vsub.f32 %v562_v27, %v646_v52 }
  0xc8   :  { %431 = vpow2.f32 %v290_v56  ;;  %v302_v1 = vmul.f32 1.442695, %v280_v21  ;;  %v304_v30 = vmul.f32 1.442695, %v281_v42  ;;  %v284_v51 = vsub.f32 %v581_v38, %v646_v52 }
  0xc9   :  { %433 = vpow2.f32 %v292_v57  ;;  %v306_v7 = vmul.f32 1.442695, %v282_v17  ;;  %v285_v19 = vsub.f32 %v613_v61, %v646_v52  ;;  %v308_v10 = vmul.f32 1.442695, %v283_v3 }
  0xca   :  { %435 = vpow2.f32 %v294_v59  ;;  %v286_v27 = vsub.f32 %v547_v20, %v646_v52  ;;  %v310_v13 = vmul.f32 1.442695, %v284_v51  ;;  %v287_v38 = vsub.f32 %v564_v28, %v646_v52 }
  0xcb   :  { %437 = vpow2.f32 %v296_v16  ;;  %v312_v18 = vmul.f32 1.442695, %v285_v19  ;;  %v288_v61 = vsub.f32 %v583_v39, %v646_v52  ;;  %v289_v20 = vsub.f32 %v621_v4, %v646_v52 }
  0xcc   :  { %439 = vpow2.f32 %v298_v29  ;;  %v314_v31 = vmul.f32 1.442695, %v286_v27  ;;  %v316_v34 = vmul.f32 1.442695, %v287_v38  ;;  %v270_v4 = vsub.f32 -inf, %v646_v52 }
  0xcd   :  { %441 = vpow2.f32 %v300_v62  ;;  %v318_v28 = vmul.f32 1.442695, %v288_v61  ;;  %v320_v41 = vmul.f32 1.442695, %v289_v20  ;;  %v242_v57 = vrot.slane %v644_v23, 4 }
  0xce   :  { %v432_v63 = vpop.eup %431  ;;  %443 = vpow2.f32 %v302_v1  ;;  %v271_v54 = vmul.f32 1.442695, %v270_v4 }
  0xcf   :  { %v434_v0 = vpop.eup %433  ;;  %445 = vpow2.f32 %v304_v30  ;;  %v243_v16 = vadd.f32 %v242_v57, %v644_v23  ;;  %v348_v30 = vld [vmem:[%s696_s3] sm:$0x1] }
  0xd0   :  { %v322_v22 = vadd.f32 %v434_v0, %v432_v63  ;;  %v436_v2 = vpop.eup %435  ;;  %447 = vpow2.f32 %v306_v7 }
  0xd1   :  { %v438_v6 = vpop.eup %437  ;;  %449 = vpow2.f32 %v308_v10  ;;  %v244_v62 = vrot.slane %v243_v16, 2 }
  0xd2   :  { %v323_v5 = vadd.f32 %v436_v2, %v322_v22  ;;  %v440_v9 = vpop.eup %439  ;;  %451 = vpow2.f32 %v310_v13 }
  0xd3   :  { %v442_v12 = vpop.eup %441  ;;  %453 = vpow2.f32 %v312_v18  ;;  %v245_v0 = vadd.f32 %v244_v62, %v243_v16 }
  0xd4   :  { %v324_v8 = vadd.f32 %v438_v6, %v323_v5  ;;  %v444_v15 = vpop.eup %443  ;;  %455 = vpow2.f32 %v314_v31 }
  0xd5   :  { %v446_v26 = vpop.eup %445  ;;  %457 = vpow2.f32 %v316_v34  ;;  %v246_v17 = vrot.slane %v245_v0, 1 }
  0xd6   :  { %v325_v11 = vadd.f32 %v440_v9, %v324_v8  ;;  %v448_v33 = vpop.eup %447  ;;  %459 = vpow2.f32 %v318_v28 }
  0xd7   :  { %v450_v36 = vpop.eup %449  ;;  %461 = vpow2.f32 %v320_v41  ;;  %v247_v2 = vadd.f32 %v246_v17, %v245_v0 }
  0xd8   :  { %v326_v14 = vadd.f32 %v442_v12, %v325_v11  ;;  %v452_v40 = vpop.eup %451  ;;  %463 = vpow2.f32 %v271_v54 }
  0xd9   :  { %v454_v44 = vpop.eup %453 }
  0xda   :  { %v327_v24 = vadd.f32 %v444_v15, %v326_v14  ;;  %v456_v45 = vpop.eup %455 }
  0xdb   :  { %v458_v47 = vpop.eup %457 }
  0xdc   :  { %v328_v32 = vadd.f32 %v446_v26, %v327_v24  ;;  %v460_v49 = vpop.eup %459 }
  0xdd   :  { %v462_v53 = vpop.eup %461 }
  0xde   :  { %v329_v35 = vadd.f32 %v448_v33, %v328_v32  ;;  %v464_v60 = vpop.eup %463 }
  0xdf   :  { %v273_v29 = vmul.f32 0.0, %v464_v60 }
  0xe0   :  { %v330_v37 = vadd.f32 %v450_v36, %v329_v35 }
  0xe2   :  { %v331_v43 = vadd.f32 %v452_v40, %v330_v37 }
  0xe4   :  { %v332_v39 = vadd.f32 %v454_v44, %v331_v43 }
  0xe6   :  { %v333_v46 = vadd.f32 %v456_v45, %v332_v39 }
  0xe8   :  { %v334_v48 = vadd.f32 %v458_v47, %v333_v46 }
  0xea   :  { %v335_v50 = vadd.f32 %v460_v49, %v334_v48 }
  0xec   :  { %v336_v25 = vadd.f32 %v462_v53, %v335_v50 }
  0xee   :  { %v337_v55 = vrot.slane %v336_v25, 4 }
  0xf0   :  { %v338_v56 = vadd.f32 %v337_v55, %v336_v25 }
  0xf2   :  { %v339_v58 = vrot.slane %v338_v56, 2 }
  0xf4   :  { %v340_v59 = vadd.f32 %v339_v58, %v338_v56 }
  0xf6   :  { %v341_v21 = vrot.slane %v340_v59, 1 }
  0xf8   :  { %v342_v42 = vadd.f32 %v341_v21, %v340_v59 }
  0xfa   :  { %v343_v63 = vadd.f32 %v342_v42, %v273_v29 }
  0xfc   :  { %465 = vlog2.f32 %v343_v63 }
 0x102   :  { %v466_v1 = vpop.eup %465 }
 0x103   :  { %v345_v22 = vmul.f32 0.6931472, %v466_v1 }
 0x105   :  { %v346_v3 = vadd.f32 %v345_v22, %v646_v52 }
 0x107   :  { %v347_v5 = vsub.f32 %v247_v2, %v346_v3 }
 0x109   :  { %v349_v6 = vmul.f32 %v348_v30, %v347_v5 }
 0x10b   :  { %350 = vst [vmem:[%s697_s4] sm:$0x1] %v349_v6  ;;  %v351_v23 = vmul.f32 1.442695, %v349_v6 }
 0x10d   :  { %467 = vpow2.f32 %v351_v23 }
 0x113   :  { %v468_v51 = vpop.eup %467 }
 0x114   :  { %353 = vst [vmem:[%s698_s5] sm:$0x1] %v468_v51 }

</bundles_post_ra>
